<compile_context>
chip_gen: v7x
topology: tpu7x:2x2x1
jax: 0.10.0
libtpu: 0.0.40
codegen_flags: <defaults>
</compile_context>

<pallas_src>
import jax
import jax.numpy as jnp
import numpy as np
from jax.experimental import pallas as pl
from jax.experimental.pallas import tpu as pltpu

# ---------------- model hyper-parameters -------------------------------------
BATCH       = 8
INPUT_DIM   = 20
NUM_CAT     = 4
HIDDEN      = [32, 32]
Z_DIM       = 16
PARAM_DTYPE = jnp.bfloat16     # MXU operand dtype (f32 accumulation kept)
OUT_DTYPE   = jnp.float32


def _round_up(v, m):
    return ((v + m - 1) // m) * m


# uniform padded width so all three layers fit one (3, MAXW, MAXW) slab
MAXW     = max(_round_up(INPUT_DIM + NUM_CAT, 8), *HIDDEN, 2 * Z_DIM)   # == 32
N_LAYERS = 3                                       # L0, L1, fused [mu|logvar] head
ONEHOT_W = MAXW - INPUT_DIM                        # lanes holding one-hot + zero pad


# ---------------- Pallas kernel ----------------------------------------------
def cvae_encoder_kernel(labels_ref, x_ref, w_ref, b_ref, mu_ref, logvar_ref, xc_ref):
    """Fused one-hot inject + 2x(Linear+ReLU) + fused mean|logvar head.

    labels_ref: (TB, 1)          int32
    x_ref:      (TB, INPUT_DIM)  f32    (unpadded)
    w_ref:      (3, MAXW, MAXW)  bf16   (W0_pad, W1_pad, [Wm|Wl]_pad)
    b_ref:      (3, 1, MAXW)     f32    (b0, b1, [bm|bl])
    mu_ref:     (TB, Z_DIM)      f32
    logvar_ref: (TB, Z_DIM)      f32
    xc_ref:     (TB, MAXW)       f32 scratch holding [x | one_hot | zeros]
    """
    tb = x_ref.shape[0]
    cdt = w_ref.dtype                                   # MXU operand dtype (bf16)

    # Stage x_cond in the scratch: lanes [0, INPUT_DIM) <- x,
    # lanes [INPUT_DIM, MAXW) <- one_hot(labels) followed by zeros.
    xc_ref[:, :INPUT_DIM] = x_ref[...].astype(jnp.float32)
    lane = jax.lax.broadcasted_iota(jnp.int32, (tb, ONEHOT_W), 1)
    # NOTE: out-of-range labels (label < 0 or label >= NUM_CAT) produce an
    # all-zero one-hot here instead of raising like torch.F.one_hot.
    xc_ref[:, INPUT_DIM:] = jnp.where(lane == labels_ref[...], 1.0, 0.0)

    # hidden layers (non_linear=True -> ReLU).  Padded rows/cols are zero so
    # they contribute nothing.  bf16 operands -> MXU, f32 accumulation,
    # bias-add / ReLU stay f32 on the VPU (v5e-safe).
    x_cond = xc_ref[...].astype(cdt)
    h = jnp.dot(x_cond, w_ref[0], preferred_element_type=jnp.float32) + b_ref[0]
    h = jnp.maximum(h, 0.0)
    h = jnp.dot(h.astype(cdt), w_ref[1], preferred_element_type=jnp.float32) + b_ref[1]
    h = jnp.maximum(h, 0.0)

    # fused distribution heads: one dot, then write the two halves directly
    # to the two outputs (no wrapper-side slicing pass).
    out = jnp.dot(h.astype(cdt), w_ref[2], preferred_element_type=jnp.float32) + b_ref[2]
    mu_ref[...]     = out[:, :Z_DIM].astype(mu_ref.dtype)
    logvar_ref[...] = out[:, Z_DIM:2 * Z_DIM].astype(logvar_ref.dtype)


def _pick_batch_tile(B, max_tb=8192):
    """Small batches -> single step; large batches -> >=2 steps (v7x megacore),
    tiles capped at ~8K rows (~1 MiB x-tile, well inside scoped VMEM)."""
    if B <= 1024:
        return B
    return min(max_tb, _round_up(pl.cdiv(B, 2), 8))


def conditional_variational_encoder(x, labels, packed):
    """Calls the fused Pallas kernel.  Returns (mu, logvar)."""
    w_slab, b_slab = packed
    B = x.shape[0]
    TB = _pick_batch_tile(B)
    nb = pl.cdiv(B, TB)

    labels2d = labels.astype(jnp.int32).reshape(B, 1)

    mu, logvar = pl.pallas_call(
        cvae_encoder_kernel,
        out_shape=(jax.ShapeDtypeStruct((B, Z_DIM), OUT_DTYPE),
                   jax.ShapeDtypeStruct((B, Z_DIM), OUT_DTYPE)),
        grid=(nb,),
        in_specs=[
            pl.BlockSpec((TB, 1), lambda i: (i, 0)),                      # labels rows
            pl.BlockSpec((TB, INPUT_DIM), lambda i: (i, 0)),              # x rows (unpadded)
            pl.BlockSpec((N_LAYERS, MAXW, MAXW), lambda i: (0, 0, 0)),    # weights (resident)
            pl.BlockSpec((N_LAYERS, 1, MAXW), lambda i: (0, 0, 0)),       # biases  (resident)
        ],
        out_specs=(pl.BlockSpec((TB, Z_DIM), lambda i: (i, 0)),           # mu rows
                   pl.BlockSpec((TB, Z_DIM), lambda i: (i, 0))),          # logvar rows
        scratch_shapes=[pltpu.VMEM((TB, MAXW), jnp.float32)],             # x_cond staging
        compiler_params=pltpu.CompilerParams(
            dimension_semantics=("parallel",)),
    )(labels2d, x, w_slab, b_slab)

    return mu, logvar


# ---------------- deterministic parameter init (mimics nn.Linear) ------------
def init_linear(key, fan_in, fan_out):
    kw, kb = jax.random.split(key)
    bound = 1.0 / np.sqrt(fan_in)
    w = jax.random.uniform(kw, (fan_in, fan_out), jnp.float32, -bound, bound)
    b = jax.random.uniform(kb, (1, fan_out), jnp.float32, -bound, bound)
    return w, b


def make_params(key):
    sizes = [INPUT_DIM + NUM_CAT] + HIDDEN            # encoder_layers (heads cut off)
    keys = jax.random.split(key, 4)
    l0 = init_linear(keys[0], sizes[0], sizes[1])
    l1 = init_linear(keys[1], sizes[1], sizes[2])
    lm = init_linear(keys[2], HIDDEN[-1], Z_DIM)       # enc_mean_layer
    ll = init_linear(keys[3], HIDDEN[-1], Z_DIM)       # enc_logvar_layer
    return (l0, l1, lm, ll)


def pack_params(params, param_dtype=PARAM_DTYPE):
    """Fuse heads, pad every layer to (MAXW, MAXW), stack into two slabs.
    Weights -> param_dtype (bf16), biases stay f32."""
    (w0, b0), (w1, b1), (wm, bm), (wl, bl) = params
    wh = jnp.concatenate([wm, wl], axis=1)             # (HIDDEN[-1], 2*Z_DIM)
    bh = jnp.concatenate([bm, bl], axis=1)             # (1, 2*Z_DIM)
    layers = [(w0, b0), (w1, b1), (wh, bh)]

    def pad_w(w):
        return jnp.pad(w, ((0, MAXW - w.shape[0]), (0, MAXW - w.shape[1])))

    def pad_b(b):
        return jnp.pad(b, ((0, 0), (0, MAXW - b.shape[1])))

    w_slab = jnp.stack([pad_w(w) for w, _ in layers]).astype(param_dtype)  # (3, MAXW, MAXW)
    b_slab = jnp.stack([pad_b(b) for _, b in layers]).astype(jnp.float32)  # (3, 1, MAXW)
    return w_slab, b_slab


# ---------------- plain-JAX reference ----------------------------------------
def reference(x, labels, params, compute_dtype=None):
    """Pure-JAX reference.  With compute_dtype set, mirrors the kernel's MXU
    operand casts (bf16 operands, f32 accumulation)."""
    (w0, b0), (w1, b1), (wm, bm), (wl, bl) = params

    def mm(a, w):
        if compute_dtype is not None:
            a = a.astype(compute_dtype)
            w = w.astype(compute_dtype)
        return jnp.dot(a, w, preferred_element_type=jnp.float32)

    c = jax.nn.one_hot(labels, NUM_CAT, dtype=jnp.float32)
    h = jnp.concatenate([x.astype(jnp.float32), c], axis=1)
    h = jnp.maximum(mm(h, w0) + b0, 0.0)
    h = jnp.maximum(mm(h, w1) + b1, 0.0)
    return mm(h, wm) + bm, mm(h, wl) + bl


if __name__ == "__main__":
    key = jax.random.PRNGKey(0)
    kx, kl, kp = jax.random.split(key, 3)

    x = jax.random.normal(kx, (BATCH, INPUT_DIM), jnp.float32)
    labels = jax.random.randint(kl, (BATCH,), 0, NUM_CAT, dtype=jnp.int32)
    params = make_params(kp)
    packed = pack_params(params)

    fwd = jax.jit(conditional_variational_encoder)
    mu, logvar = fwd(x, labels, packed)
    jax.block_until_ready((mu, logvar))

    # Reference mirroring the kernel's bf16 MXU operands (tight check).
    mu_m, lv_m = reference(x, labels, params, compute_dtype=PARAM_DTYPE)
    assert np.allclose(np.asarray(mu), np.asarray(mu_m), atol=1e-3, rtol=1e-3)
    assert np.allclose(np.asarray(logvar), np.asarray(lv_m), atol=1e-3, rtol=1e-3)

    # Full-f32 reference (bounds the overall bf16-weight quantization error).
    mu_f, lv_f = reference(x, labels, params)
    assert np.allclose(np.asarray(mu), np.asarray(mu_f), atol=5e-2)
    assert np.allclose(np.asarray(logvar), np.asarray(lv_f), atol=5e-2)

    print("KERNEL_OK")
</pallas_src>

<mosaic_0001>
module attributes {stable_mosaic.version = 11 : i64} {
  func.func @cvae_encoder_kernel(%arg0: i32, %arg1: memref<8x1xi32, #tpu.memory_space<vmem>>, %arg2: memref<8x20xf32, #tpu.memory_space<vmem>>, %arg3: memref<3x32x32xbf16, #tpu.memory_space<vmem>>, %arg4: memref<3x1x32xf32, #tpu.memory_space<vmem>>, %arg5: memref<8x16xf32, #tpu.memory_space<vmem>>, %arg6: memref<8x16xf32, #tpu.memory_space<vmem>>, %arg7: memref<8x32xf32, #tpu.memory_space<vmem>>) attributes {dimension_semantics = [#tpu.dimension_semantics<parallel>], iteration_bounds = array<i64: 1>, scalar_prefetch = 0 : i64, scratch_operands = 1 : i64, tpu.core_type = #tpu.core_type<tc>, window_params = [{transform_indices = @transform_0, window_bounds = array<i64: 8, 1>}, {transform_indices = @transform_1, window_bounds = array<i64: 8, 20>}, {pipeline_mode = #tpu.pipeline_mode<synchronous>, transform_indices = @transform_2, window_bounds = array<i64: 3, 32, 32>}, {pipeline_mode = #tpu.pipeline_mode<synchronous>, transform_indices = @transform_3, window_bounds = array<i64: 3, 1, 32>}, {transform_indices = @transform_4, window_bounds = array<i64: 8, 16>}, {transform_indices = @transform_5, window_bounds = array<i64: 8, 16>}]} {
    %c0 = arith.constant 0 : index
    %c0_0 = arith.constant 0 : index
    %0 = vector.load %arg2[%c0, %c0_0] : memref<8x20xf32, #tpu.memory_space<vmem>>, vector<8x20xf32>
    %c0_1 = arith.constant 0 : index
    %c0_2 = arith.constant 0 : index
    %1 = vector.load %arg7[%c0_1, %c0_2] : memref<8x32xf32, #tpu.memory_space<vmem>>, vector<8x20xf32>
    tpu.vector_store %arg7[%c0_1, %c0_2], %0 {strides = array<i32>} : memref<8x32xf32, #tpu.memory_space<vmem>>, vector<8x20xf32>,
    %2 = tpu.iota {dimensions = array<i32: 1>} : vector<8x12xi32>
    %c0_3 = arith.constant 0 : index
    %c0_4 = arith.constant 0 : index
    %3 = vector.load %arg1[%c0_3, %c0_4] : memref<8x1xi32, #tpu.memory_space<vmem>>, vector<8x1xi32>
    %4 = vector.broadcast %3 : vector<8x1xi32> to vector<8x12xi32>
    %5 = arith.cmpi eq, %2, %4 : vector<8x12xi32>
    %cst = arith.constant 1.000000e+00 : f32
    %cst_5 = arith.constant 0.000000e+00 : f32
    %6 = vector.broadcast %cst : f32 to vector<8x12xf32>
    %7 = vector.broadcast %cst_5 : f32 to vector<8x12xf32>
    %8 = arith.select %5, %6, %7 : vector<8x12xi1>, vector<8x12xf32>
    %c0_6 = arith.constant 0 : index
    %c20 = arith.constant 20 : index
    %9 = vector.load %arg7[%c0_6, %c20] : memref<8x32xf32, #tpu.memory_space<vmem>>, vector<8x12xf32>
    tpu.vector_store %arg7[%c0_6, %c20], %8 {strides = array<i32>} : memref<8x32xf32, #tpu.memory_space<vmem>>, vector<8x12xf32>,
    %c0_7 = arith.constant 0 : index
    %c0_8 = arith.constant 0 : index
    %10 = vector.load %arg7[%c0_7, %c0_8] : memref<8x32xf32, #tpu.memory_space<vmem>>, vector<8x32xf32>
    %11 = arith.truncf %10 : vector<8x32xf32> to vector<8x32xbf16>
    %c0_9 = arith.constant 0 : index
    %c0_10 = arith.constant 0 : index
    %c0_11 = arith.constant 0 : index
    %12 = vector.load %arg3[%c0_9, %c0_10, %c0_11] : memref<3x32x32xbf16, #tpu.memory_space<vmem>>, vector<1x32x32xbf16>
    %13 = vector.shape_cast %12 : vector<1x32x32xbf16> to vector<32x32xbf16>
    %cst_12 = arith.constant dense<0.000000e+00> : vector<8x32xf32>
    %14 = tpu.matmul %11, %13, %cst_12 {dimension_numbers = #tpu.dot_dimension_numbers<[1], [0], [0], [1], [0, 0, 1, 1], [], []>} : vector<8x32xbf16>, vector<32x32xbf16>, vector<8x32xf32> -> vector<8x32xf32>
    %c0_13 = arith.constant 0 : index
    %c0_14 = arith.constant 0 : index
    %c0_15 = arith.constant 0 : index
    %15 = vector.load %arg4[%c0_13, %c0_14, %c0_15] : memref<3x1x32xf32, #tpu.memory_space<vmem>>, vector<1x1x32xf32>
    %16 = vector.shape_cast %15 : vector<1x1x32xf32> to vector<1x32xf32>
    %17 = vector.broadcast %16 : vector<1x32xf32> to vector<8x32xf32>
    %18 = arith.addf %14, %17 : vector<8x32xf32>
    %cst_16 = arith.constant 0.000000e+00 : f32
    %19 = vector.broadcast %cst_16 : f32 to vector<8x32xf32>
    %20 = arith.maximumf %18, %19 : vector<8x32xf32>
    %21 = arith.truncf %20 : vector<8x32xf32> to vector<8x32xbf16>
    %c1 = arith.constant 1 : index
    %c0_17 = arith.constant 0 : index
    %c0_18 = arith.constant 0 : index
    %22 = vector.load %arg3[%c1, %c0_17, %c0_18] : memref<3x32x32xbf16, #tpu.memory_space<vmem>>, vector<1x32x32xbf16>
    %23 = vector.shape_cast %22 : vector<1x32x32xbf16> to vector<32x32xbf16>
    %cst_19 = arith.constant dense<0.000000e+00> : vector<8x32xf32>
    %24 = tpu.matmul %21, %23, %cst_19 {dimension_numbers = #tpu.dot_dimension_numbers<[1], [0], [0], [1], [0, 0, 1, 1], [], []>} : vector<8x32xbf16>, vector<32x32xbf16>, vector<8x32xf32> -> vector<8x32xf32>
    %c1_20 = arith.constant 1 : index
    %c0_21 = arith.constant 0 : index
    %c0_22 = arith.constant 0 : index
    %25 = vector.load %arg4[%c1_20, %c0_21, %c0_22] : memref<3x1x32xf32, #tpu.memory_space<vmem>>, vector<1x1x32xf32>
    %26 = vector.shape_cast %25 : vector<1x1x32xf32> to vector<1x32xf32>
    %27 = vector.broadcast %26 : vector<1x32xf32> to vector<8x32xf32>
    %28 = arith.addf %24, %27 : vector<8x32xf32>
    %cst_23 = arith.constant 0.000000e+00 : f32
    %29 = vector.broadcast %cst_23 : f32 to vector<8x32xf32>
    %30 = arith.maximumf %28, %29 : vector<8x32xf32>
    %31 = arith.truncf %30 : vector<8x32xf32> to vector<8x32xbf16>
    %c2 = arith.constant 2 : index
    %c0_24 = arith.constant 0 : index
    %c0_25 = arith.constant 0 : index
    %32 = vector.load %arg3[%c2, %c0_24, %c0_25] : memref<3x32x32xbf16, #tpu.memory_space<vmem>>, vector<1x32x32xbf16>
    %33 = vector.shape_cast %32 : vector<1x32x32xbf16> to vector<32x32xbf16>
    %cst_26 = arith.constant dense<0.000000e+00> : vector<8x32xf32>
    %34 = tpu.matmul %31, %33, %cst_26 {dimension_numbers = #tpu.dot_dimension_numbers<[1], [0], [0], [1], [0, 0, 1, 1], [], []>} : vector<8x32xbf16>, vector<32x32xbf16>, vector<8x32xf32> -> vector<8x32xf32>
    %c2_27 = arith.constant 2 : index
    %c0_28 = arith.constant 0 : index
    %c0_29 = arith.constant 0 : index
    %35 = vector.load %arg4[%c2_27, %c0_28, %c0_29] : memref<3x1x32xf32, #tpu.memory_space<vmem>>, vector<1x1x32xf32>
    %36 = vector.shape_cast %35 : vector<1x1x32xf32> to vector<1x32xf32>
    %37 = vector.broadcast %36 : vector<1x32xf32> to vector<8x32xf32>
    %38 = arith.addf %34, %37 : vector<8x32xf32>
    %39 = vector.extract_strided_slice %38 {offsets = [0, 0], sizes = [8, 16], strides = [1, 1]} : vector<8x32xf32> to vector<8x16xf32>
    %c0_30 = arith.constant 0 : index
    %c0_31 = arith.constant 0 : index
    %40 = vector.load %arg5[%c0_30, %c0_31] : memref<8x16xf32, #tpu.memory_space<vmem>>, vector<8x16xf32>
    tpu.vector_store %arg5[%c0_30, %c0_31], %39 {strides = array<i32>} : memref<8x16xf32, #tpu.memory_space<vmem>>, vector<8x16xf32>,
    %41 = vector.extract_strided_slice %38 {offsets = [0, 16], sizes = [8, 16], strides = [1, 1]} : vector<8x32xf32> to vector<8x16xf32>
    %c0_32 = arith.constant 0 : index
    %c0_33 = arith.constant 0 : index
    %42 = vector.load %arg6[%c0_32, %c0_33] : memref<8x16xf32, #tpu.memory_space<vmem>>, vector<8x16xf32>
    tpu.vector_store %arg6[%c0_32, %c0_33], %41 {strides = array<i32>} : memref<8x16xf32, #tpu.memory_space<vmem>>, vector<8x16xf32>,
    return
  }
  func.func @transform_0(%arg0: i32) -> (i32, i32) {
    %c0_i32 = arith.constant 0 : i32
    %c0_i32_0 = arith.constant 0 : i32
    return %arg0, %c0_i32 : i32, i32
  }
  func.func @transform_1(%arg0: i32) -> (i32, i32) {
    %c0_i32 = arith.constant 0 : i32
    %c0_i32_0 = arith.constant 0 : i32
    return %arg0, %c0_i32 : i32, i32
  }
  func.func @transform_2(%arg0: i32) -> (i32, i32, i32) {
    %c0_i32 = arith.constant 0 : i32
    %c0_i32_0 = arith.constant 0 : i32
    %c0_i32_1 = arith.constant 0 : i32
    %c0_i32_2 = arith.constant 0 : i32
    return %c0_i32, %c0_i32_0, %c0_i32_1 : i32, i32, i32
  }
  func.func @transform_3(%arg0: i32) -> (i32, i32, i32) {
    %c0_i32 = arith.constant 0 : i32
    %c0_i32_0 = arith.constant 0 : i32
    %c0_i32_1 = arith.constant 0 : i32
    %c0_i32_2 = arith.constant 0 : i32
    return %c0_i32, %c0_i32_0, %c0_i32_1 : i32, i32, i32
  }
  func.func @transform_4(%arg0: i32) -> (i32, i32) {
    %c0_i32 = arith.constant 0 : i32
    %c0_i32_0 = arith.constant 0 : i32
    return %arg0, %c0_i32 : i32, i32
  }
  func.func @transform_5(%arg0: i32) -> (i32, i32) {
    %c0_i32 = arith.constant 0 : i32
    %c0_i32_0 = arith.constant 0 : i32
    return %arg0, %c0_i32 : i32, i32
  }
}

</mosaic_0001>

<bundles_post_ra>
// kernel: conditional_variational_encoder.1
= control target key start
LH: loop header
LB: loop body
LE: loop exit
PB: predicated region body
PF: predicated region fallthrough
CT: control target
= control target key end

     0   :  { %11 = vsyncpa [#allocation4], 0  ;;  %s533_s0 = inlined_call_operand.vmem [shape: s32[8,1], index: 0, kind: input, shape index: {}]   ;;  %s534_s1 = inlined_call_operand.vmem [shape: f32[8,20], index: 1, kind: input, shape index: {}]   ;;  %s535_s2 = inlined_call_operand.hbm [shape: bf16[3,32,32], index: 2, kind: input, shape index: {}]   ;;  %s536_s3 = inlined_call_operand.vmem [shape: f32[3,1,32], index: 3, kind: input, shape index: {}]   ;;  %s537_s4 = inlined_call_operand.hbm [shape: f32[8,16], index: 4, kind: output, shape index: {0}]   ;;  %s538_s5 = inlined_call_operand.hbm [shape: f32[8,16], index: 5, kind: output, shape index: {1}]  }
   0x1   :  { %12 = vsyncpa [#allocation5], 0 }
   0x2   :  { %13 = vsyncpa [#allocation8], 0  ;;  %s434_s18 = smov [#allocation3]   ;;  %s362_s22 = scalar_lea.hbm %s535_s2, 768 }
   0x3   :  { %s23_s19 = sshll.u32 %s434_s18, 4  ;;  %p363_p0 = scmp.ne.s32.totalorder %s535_s2, %s362_s22  ;;  %s24_s19 = int_to_ptr.vmem [resolvable:$true] %s23_s19 }
   0x4   :  { %p366_p1 = scmp.lt.u32.totalorder %s362_s22, %s535_s2 }
   0x6   :  { %p368_p2 = pnand %p366_p1, %p363_p0 }
   0x8   :  { %371 = shalt.err (!%p368_p2)
}
   0x9   :  { %s372_s27 = scalar_lea.vmem %s24_s19, 768  ;;  %p377_p4 = scmp.lt.s32.totalorder %s24_s19, %s24_s19 }
   0xa   :  { %p373_p3 = scmp.ne.s32.totalorder %s24_s19, %s372_s27  ;;  %p378_p5 = scmp.lt.s32.totalorder %s372_s27, %s372_s27 }
   0xc   :  { %p379_p6 = por %p378_p5, %p377_p4 }
   0xe   :  { %p380_p7 = pnand %p379_p6, %p373_p3 }
  0x10   :  { %383 = shalt.err (!%p380_p7)
}
  0x11   :  { %s435_s28 = smov 64   ;;  %s436_s29 = smov 4  }
  0x12   :  { %29 = dma.hbm_to_vmem [thread:$0]  %s535_s2, 768, %s24_s19, [#allocation4], %s435_s28, %s435_s28, %s436_s29  }
  0x13   :  { %428 = dma.done.wait [#allocation4], 768  }
  0x14   :  { %429 = vsyncadd [#allocation4], 4294966528  ;;  %v437_v0 = vmov 0   ;;  %v438_v1 = vmov 0.0   ;;  %v41_v2 = vld [vmem:[%s533_s0] sm:$0xff]  ;;  %vm37_vm0 = vcmask 162816   ;;  %v39_v6 = vlaneseq }
  0x15   :  { %355 = vset.pattern.permute.xlu0 %v437_v0  ;;  %321 = vmatprep.subr.bf16.mxu0 %v438_v1  ;;  %v36_v3 = vld [vmem:[%s534_s1] sm:$0xff]  ;;  %v356_v4 = vld [vmem:[#allocation3] sm:$0xff]   ;;  %vm439_vm1 = vmmov 0   ;;  %v357_v5 = vld [vmem:[#allocation3 + $0x8] sm:$0xff]   ;;  %s440_s0 = smov 20   ;;  %vm51_vm3 = vcmask 261280  }
  0x16   :  { %329 = vmatprep.subr.bf16.mxu1 %v438_v1  ;;  %43 = vperm.xlu0 %355, %v41_v2   ;;  %38 = vst.msk [vmem:[#allocation2] sm:$0xff] %vm37_vm0, %v36_v3  ;;  %v40_v7 = vand.u32 127, %v39_v6  ;;  %vm78_vm4 = vcmask 261120   ;;  %v358_v13 = vld [vmem:[#allocation3 + $0x10] sm:$0xff]   ;;  %v359_v14 = vld [vmem:[#allocation3 + $0x18] sm:$0xff]   ;;  %v360_v15 = vld [vmem:[#allocation3 + $0x20] sm:$0xff]  }
  0x17   :  { %325 = vmatprep.mubr.msk.bf16.mxu0 %vm439_vm1, %v438_v1  ;;  %333 = vmatprep.mubr.msk.bf16.mxu1 %vm439_vm1, %v438_v1  ;;  %v298_v16 = vld [vmem:[%s536_s3] ss:$0 sm:$0xff]  ;;  %v361_v24 = vld [vmem:[#allocation3 + $0x28] sm:$0xff]   ;;  %v303_v25 = vld [vmem:[%s536_s3 + $0x1] ss:$0 sm:$0xff]  ;;  %s441_s15 = smov [#allocation6]  }
  0x18   :  { %322 = vmatpush3.bf16.msra.mxu0 %v356_v4  ;;  %330 = vmatpush3.bf16.msra.mxu1 %v358_v13  ;;  %v308_v33 = vld [vmem:[%s536_s3 + $0x2] ss:$0 sm:$0xff]  ;;  %s275_s16 = sshll.u32 %s441_s15, 4  ;;  %vm262_vm5 = vcmask 130048   ;;  %s442_s17 = smov 112   ;;  %s276_s16 = int_to_ptr.vmem [resolvable:$true] %s275_s16 }
  0x19   :  { %323 = vmatprep.subr.bf16.mxu0 %v438_v1  ;;  %331 = vmatprep.subr.bf16.mxu1 %v438_v1  ;;  %s384_s18 = scalar_lea.vmem %s276_s16, 128  ;;  %p389_p9 = scmp.lt.s32.totalorder %s276_s16, %s276_s16 }
  0x1a   :  { %p385_p8 = scmp.ne.s32.totalorder %s276_s16, %s384_s18  ;;  %p390_p10 = scmp.lt.s32.totalorder %s384_s18, %s384_s18 }
  0x1c   :  { %324 = vmatpush3.bf16.msra.mxu0 %v357_v5  ;;  %332 = vmatpush3.bf16.msra.mxu1 %v359_v14  ;;  %p391_p11 = por %p390_p10, %p389_p9 }
  0x1d   :  { %337 = vmatprep.subr.bf16.mxu0 %v438_v1 }
  0x1e   :  { %p392_p12 = pnand %p391_p11, %p385_p8 }
  0x95   :  { %v44_v8 = vpop.permute.xlu0 %43 }
  0x96   :  { %vm45_vm2 = vcmp.eq.s32.totalorder %v40_v7, %v44_v8 }
  0x97   :  { %v46_v9 = vsel %vm45_vm2, 1.0, %v438_v1 }
  0x98   :  { %48 = vrot.lane.b32.xlu0 %v46_v9, %s440_s0 }
 0x10a   :  { %v49_v10 = vpop.permute.xlu0 %48 }
 0x10b   :  { %52 = vst.msk [vmem:[#allocation2] sm:$0xff] %vm51_vm3, %v49_v10 }
 0x112   :  { %v53_v11 = vld [vmem:[#allocation2] sm:$0xff] }
 0x113   :  { %v54_v12 = vpack.c.bf16 %v53_v11, %v53_v11 }
 0x115   :  { %326 = vmatmul.mubr.msk.bf16.vlgmr.msra.gmra.mrb[0].mxu0 %vm78_vm4, %v54_v12 }
 0x116   :  { %341 = vmatprep.mubr.msk.bf16.mxu0 %vm439_vm1, %v438_v1  ;;  %338 = vmatpush3.bf16.msra.mxu0 %v360_v15 }
 0x117   :  { %339 = vmatprep.subr.bf16.mxu0 %v438_v1 }
 0x11a   :  { %340 = vmatpush3.bf16.msra.mxu0 %v361_v24 }
 0x1e8   :  { %v116_v17 = vpop.f32.mrb[0].mxu0 }
 0x1e9   :  { %v117_v18 = vadd.f32 %v298_v16, %v116_v17  ;;  %v327_v19 = vpop.f32.mrb[1].mxu0 }
 0x1ea   :  { %v119_v20 = vpop.f32.mrb[2].mxu0 }
 0x1eb   :  { %v122_v21 = vmax.f32 %v117_v18, 0.0  ;;  %v328_v22 = vpop.f32.mrb[3].mxu0 }
 0x1ed   :  { %v123_v23 = vpack.c.bf16 %v122_v21, %v122_v21 }
 0x1ef   :  { %334 = vmatmul.mubr.msk.bf16.vlgmr.msra.gmra.mrb[0].mxu1 %vm78_vm4, %v123_v23 }
 0x2c2   :  { %v186_v26 = vpop.f32.mrb[0].mxu1 }
 0x2c3   :  { %v187_v27 = vadd.f32 %v303_v25, %v186_v26  ;;  %v335_v28 = vpop.f32.mrb[1].mxu1 }
 0x2c4   :  { %v189_v29 = vpop.f32.mrb[2].mxu1 }
 0x2c5   :  { %v192_v30 = vmax.f32 %v187_v27, 0.0  ;;  %v336_v31 = vpop.f32.mrb[3].mxu1 }
 0x2c7   :  { %v193_v32 = vpack.c.bf16 %v192_v30, %v192_v30 }
 0x2c9   :  { %342 = vmatmul.mubr.msk.bf16.vlgmr.msra.gmra.mrb[4].mxu0 %vm78_vm4, %v193_v32 }
 0x39c   :  { %v256_v34 = vpop.f32.mrb[4].mxu0 }
 0x39d   :  { %v257_v35 = vadd.f32 %v308_v33, %v256_v34  ;;  %v343_v36 = vpop.f32.mrb[5].mxu0 }
 0x39e   :  { %v259_v37 = vpop.f32.mrb[6].mxu0 }
 0x39f   :  { %265 = vrot.lane.b32.xlu1 %v257_v35, %s442_s17  ;;  %v344_v38 = vpop.f32.mrb[7].mxu0  ;;  %263 = vst.msk [vmem:[#allocation6] sm:$0xff] %vm262_vm5, %v257_v35 }
 0x3a0   :  { %395 = shalt.err (!%p392_p12)
}
 0x3a1   :  { %s396_s20 = scalar_lea.hbm %s537_s4, 128 }
 0x3a2   :  { %p397_p13 = scmp.ne.s32.totalorder %s537_s4, %s396_s20  ;;  %p400_p0 = scmp.lt.u32.totalorder %s396_s20, %s537_s4 }
 0x3a4   :  { %p402_p1 = pnand %p400_p0, %p397_p13 }
 0x3a6   :  { %405 = shalt.err (!%p402_p1)
}
 0x3a7   :  { %278 = dma.vmem_to_hbm [thread:$0]  %s276_s16, 128, %s537_s4, [#allocation5]  }
 0x3a8   :  { %s443_s27 = smov [#allocation7]  }
 0x3a9   :  { %s285_s28 = sshll.u32 %s443_s27, 4  ;;  %s286_s28 = int_to_ptr.vmem [resolvable:$true] %s285_s28 }
 0x3aa   :  { %s406_s29 = scalar_lea.vmem %s286_s28, 128  ;;  %p411_p3 = scmp.lt.s32.totalorder %s286_s28, %s286_s28 }
 0x3ab   :  { %p407_p2 = scmp.ne.s32.totalorder %s286_s28, %s406_s29  ;;  %p412_p4 = scmp.lt.s32.totalorder %s406_s29, %s406_s29 }
 0x3ad   :  { %p413_p5 = por %p412_p4, %p411_p3 }
 0x3af   :  { %p414_p6 = pnand %p413_p5, %p407_p2 }
 0x411   :  { %v266_v39 = vpop.permute.xlu1 %265 }
 0x412   :  { %268 = vst.msk [vmem:[#allocation7] sm:$0xff] %vm262_vm5, %v266_v39 }
 0x413   :  { %417 = shalt.err (!%p414_p6)
}
 0x414   :  { %s418_s7 = scalar_lea.hbm %s538_s5, 128 }
 0x415   :  { %p419_p7 = scmp.ne.s32.totalorder %s538_s5, %s418_s7  ;;  %p422_p8 = scmp.lt.u32.totalorder %s418_s7, %s538_s5 }
 0x417   :  { %p424_p9 = pnand %p422_p8, %p419_p7 }
 0x419   :  { %427 = shalt.err (!%p424_p9)
}
 0x41a   :  { %288 = dma.vmem_to_hbm [thread:$0]  %s286_s28, 128, %s538_s5, [#allocation8]  }
 0x41b   :  { %430 = dma.done.wait [#allocation5], 128  }
 0x41c   :  { %431 = vsyncadd [#allocation5], 4294967168 }
 0x41d   :  { %432 = dma.done.wait [#allocation8], 128  }
 0x41e   :  { %433 = vsyncadd [#allocation8], 4294967168 }
 0x41f   :  { %295 = vsyncpa [#allocation4], 1 }
 0x420   :  { %296 = vsyncpa [#allocation5], 1 }
 0x421   :  { %297 = vsyncpa [#allocation8], 1 }

</bundles_post_ra>
